<compile_context>
chip_gen: v7x
topology: tpu7x:2x2x1
jax: 0.10.0
libtpu: 0.0.40
codegen_flags: <defaults>
</compile_context>

<pallas_src>
import jax
import jax.numpy as jnp
from jax.experimental import pallas as pl
from jax.experimental.pallas import tpu as pltpu

IN_DIM = 1024
HID_DIM = 128
OUT_DIM = 2
DROP_P = 0.5          # F.dropout default
KEEP_SCALE = 1.0 / (1.0 - DROP_P)


def _softplus(z):
    # numerically stable softplus: log(1 + exp(z))
    return jnp.maximum(z, 0.0) + jnp.log1p(jnp.exp(-jnp.abs(z)))


def dropout_net_kernel(x_ref, w1_ref, b1_ref, w2_ref, b2_ref, m1_ref, m2_ref, o_ref):
    # ---- Linear 1 (bf16 MXU, f32 accumulate) + bias + ReLU ----
    h = jnp.dot(x_ref[...], w1_ref[...], preferred_element_type=jnp.float32)  # (TB, 128)
    h = jnp.maximum(h + b1_ref[...], 0.0)

    # ---- Dropout 1: pre-scaled keep mask (values are 0.0 or 1/(1-p)) ----
    h = h * m1_ref[...].astype(jnp.float32)

    # ---- Linear 2 ----
    y = jnp.dot(h.astype(jnp.bfloat16), w2_ref[...],
                preferred_element_type=jnp.float32)                           # (TB, 2)
    y = y + b2_ref[...]

    # ---- Dropout 2 ----
    y = y * m2_ref[...].astype(jnp.float32)

    # ---- 2-class log_softmax (closed form, no cross-lane reduce) ----
    # log_softmax = [-softplus(-(y0-y1)), -softplus(y0-y1)]
    d = y[:, 0:1] - y[:, 1:2]                                                 # (TB, 1)
    col = jax.lax.broadcasted_iota(jnp.int32, y.shape, 1)                     # (TB, 2)
    z = jnp.where(col == 0, -d, d)                                            # (TB, 2)
    o_ref[...] = (-_softplus(z)).astype(o_ref.dtype)


def dropout_network_forward(x, w1, b1, w2, b2, mask1, mask2):
    """x: (B, 1024) f32; masks pre-scaled keep masks (B,128)/(B,2).
    Returns (B, 2) f32 log-probabilities."""
    B = x.shape[0]
    TB = min(B, 512)                       # batch tile; bounds VMEM, enables pipelining
    grid = (pl.cdiv(B, TB),)

    x_bf = x.astype(jnp.bfloat16)
    w1_bf = w1.astype(jnp.bfloat16)
    w2_bf = w2.astype(jnp.bfloat16)
    b1_2d = b1.reshape(1, HID_DIM).astype(jnp.float32)
    b2_2d = b2.reshape(1, OUT_DIM).astype(jnp.float32)
    m1_bf = mask1.astype(jnp.bfloat16)     # 0.0 / 2.0 — exact in bf16
    m2_bf = mask2.astype(jnp.bfloat16)

    return pl.pallas_call(
        dropout_net_kernel,
        out_shape=jax.ShapeDtypeStruct((B, OUT_DIM), jnp.float32),
        grid=grid,
        in_specs=[
            pl.BlockSpec((TB, IN_DIM),       lambda i: (i, 0)),   # x tile, streamed
            pl.BlockSpec((IN_DIM, HID_DIM),  lambda i: (0, 0)),   # w1, VMEM-resident
            pl.BlockSpec((1, HID_DIM),       lambda i: (0, 0)),   # b1
            pl.BlockSpec((HID_DIM, OUT_DIM), lambda i: (0, 0)),   # w2
            pl.BlockSpec((1, OUT_DIM),       lambda i: (0, 0)),   # b2
            pl.BlockSpec((TB, HID_DIM),      lambda i: (i, 0)),   # dropout mask 1
            pl.BlockSpec((TB, OUT_DIM),      lambda i: (i, 0)),   # dropout mask 2
        ],
        out_specs=pl.BlockSpec((TB, OUT_DIM), lambda i: (i, 0)),
        compiler_params=pltpu.CompilerParams(
            dimension_semantics=("parallel",),   # shard batch tiles across TCs (v7x)
        ),
    )(x_bf, w1_bf, b1_2d, w2_bf, b2_2d, m1_bf, m2_bf)


def make_dropout_masks(key, batch, p=DROP_P):
    """Pre-scaled keep masks: 0.0 with prob p, 1/(1-p) with prob (1-p)."""
    k1, k2 = jax.random.split(key)
    m1 = jax.random.bernoulli(k1, 1.0 - p, (batch, HID_DIM)).astype(jnp.float32) * (1.0 / (1.0 - p))
    m2 = jax.random.bernoulli(k2, 1.0 - p, (batch, OUT_DIM)).astype(jnp.float32) * (1.0 / (1.0 - p))
    return m1, m2


def init_params(key):
    """Deterministic init mimicking nn.Linear default U(-1/sqrt(fan_in), +1/sqrt(fan_in))."""
    k1, k2, k3, k4 = jax.random.split(key, 4)
    lim1 = 1.0 / jnp.sqrt(IN_DIM)
    lim2 = 1.0 / jnp.sqrt(HID_DIM)
    w1 = jax.random.uniform(k1, (IN_DIM, HID_DIM), jnp.float32, -lim1, lim1)
    b1 = jax.random.uniform(k2, (HID_DIM,), jnp.float32, -lim1, lim1)
    w2 = jax.random.uniform(k3, (HID_DIM, OUT_DIM), jnp.float32, -lim2, lim2)
    b2 = jax.random.uniform(k4, (OUT_DIM,), jnp.float32, -lim2, lim2)
    return w1, b1, w2, b2


def reference_forward(x, w1, b1, w2, b2, m1, m2):
    """Pure-JAX reference with the same bf16 input quantization as the kernel."""
    xb, w1b, w2b = (a.astype(jnp.bfloat16) for a in (x, w1, w2))
    h = jnp.dot(xb, w1b, preferred_element_type=jnp.float32) + b1
    h = jnp.maximum(h, 0.0) * m1
    y = jnp.dot(h.astype(jnp.bfloat16), w2b, preferred_element_type=jnp.float32) + b2
    y = y * m2
    return jax.nn.log_softmax(y, axis=1)


if __name__ == "__main__":
    key = jax.random.PRNGKey(0)
    k_params, k_x, k_drop = jax.random.split(key, 3)

    w1, b1, w2, b2 = init_params(k_params)

    B = 8
    x = jax.random.normal(k_x, (B, IN_DIM), dtype=jnp.float32)
    m1, m2 = make_dropout_masks(k_drop, B)

    out = dropout_network_forward(x, w1, b1, w2, b2, m1, m2)
    out = jax.block_until_ready(out)

    assert out.shape == (B, OUT_DIM)
    assert out.dtype == jnp.float32

    # log_softmax rows must normalize: logsumexp(row) == 0
    lse = jax.scipy.special.logsumexp(out, axis=1)
    assert jnp.allclose(lse, 0.0, atol=1e-5), lse

    # numerical check against a pure-JAX reference using the same masks / bf16 casts
    ref = reference_forward(x, w1, b1, w2, b2, m1, m2)
    assert jnp.allclose(out, ref, atol=5e-2, rtol=5e-2), jnp.max(jnp.abs(out - ref))

    print("KERNEL_OK")
</pallas_src>

<mosaic_0001>
module attributes {stable_mosaic.version = 11 : i64} {
  func.func @dropout_net_kernel(%arg0: i32, %arg1: memref<8x1024xbf16, #tpu.memory_space<vmem>>, %arg2: memref<1024x128xbf16, #tpu.memory_space<vmem>>, %arg3: memref<1x128xf32, #tpu.memory_space<vmem>>, %arg4: memref<128x2xbf16, #tpu.memory_space<vmem>>, %arg5: memref<1x2xf32, #tpu.memory_space<vmem>>, %arg6: memref<8x128xbf16, #tpu.memory_space<vmem>>, %arg7: memref<8x2xbf16, #tpu.memory_space<vmem>>, %arg8: memref<8x2xf32, #tpu.memory_space<vmem>>) attributes {dimension_semantics = [#tpu.dimension_semantics<parallel>], iteration_bounds = array<i64: 1>, scalar_prefetch = 0 : i64, scratch_operands = 0 : i64, tpu.core_type = #tpu.core_type<tc>, window_params = [{transform_indices = @transform_0, window_bounds = array<i64: 8, 1024>}, {pipeline_mode = #tpu.pipeline_mode<synchronous>, transform_indices = @transform_1, window_bounds = array<i64: 1024, 128>}, {pipeline_mode = #tpu.pipeline_mode<synchronous>, transform_indices = @transform_2, window_bounds = array<i64: 1, 128>}, {pipeline_mode = #tpu.pipeline_mode<synchronous>, transform_indices = @transform_3, window_bounds = array<i64: 128, 2>}, {pipeline_mode = #tpu.pipeline_mode<synchronous>, transform_indices = @transform_4, window_bounds = array<i64: 1, 2>}, {transform_indices = @transform_5, window_bounds = array<i64: 8, 128>}, {transform_indices = @transform_6, window_bounds = array<i64: 8, 2>}, {transform_indices = @transform_7, window_bounds = array<i64: 8, 2>}]} {
    %c0 = arith.constant 0 : index
    %c0_0 = arith.constant 0 : index
    %0 = vector.load %arg1[%c0, %c0_0] : memref<8x1024xbf16, #tpu.memory_space<vmem>>, vector<8x1024xbf16>
    %c0_1 = arith.constant 0 : index
    %c0_2 = arith.constant 0 : index
    %1 = vector.load %arg2[%c0_1, %c0_2] : memref<1024x128xbf16, #tpu.memory_space<vmem>>, vector<1024x128xbf16>
    %cst = arith.constant dense<0.000000e+00> : vector<8x128xf32>
    %2 = tpu.matmul %0, %1, %cst {dimension_numbers = #tpu.dot_dimension_numbers<[1], [0], [0], [1], [0, 0, 1, 1], [], []>} : vector<8x1024xbf16>, vector<1024x128xbf16>, vector<8x128xf32> -> vector<8x128xf32>
    %c0_3 = arith.constant 0 : index
    %c0_4 = arith.constant 0 : index
    %3 = vector.load %arg3[%c0_3, %c0_4] : memref<1x128xf32, #tpu.memory_space<vmem>>, vector<1x128xf32>
    %4 = vector.broadcast %3 : vector<1x128xf32> to vector<8x128xf32>
    %5 = arith.addf %2, %4 : vector<8x128xf32>
    %cst_5 = arith.constant 0.000000e+00 : f32
    %6 = vector.broadcast %cst_5 : f32 to vector<8x128xf32>
    %7 = arith.maximumf %5, %6 : vector<8x128xf32>
    %c0_6 = arith.constant 0 : index
    %c0_7 = arith.constant 0 : index
    %8 = vector.load %arg6[%c0_6, %c0_7] : memref<8x128xbf16, #tpu.memory_space<vmem>>, vector<8x128xbf16>
    %9 = arith.extf %8 : vector<8x128xbf16> to vector<8x128xf32>
    %10 = arith.mulf %7, %9 : vector<8x128xf32>
    %11 = arith.truncf %10 : vector<8x128xf32> to vector<8x128xbf16>
    %c0_8 = arith.constant 0 : index
    %c0_9 = arith.constant 0 : index
    %12 = vector.load %arg4[%c0_8, %c0_9] : memref<128x2xbf16, #tpu.memory_space<vmem>>, vector<128x2xbf16>
    %cst_10 = arith.constant dense<0.000000e+00> : vector<8x2xf32>
    %13 = tpu.matmul %11, %12, %cst_10 {dimension_numbers = #tpu.dot_dimension_numbers<[1], [0], [0], [1], [0, 0, 1, 1], [], []>} : vector<8x128xbf16>, vector<128x2xbf16>, vector<8x2xf32> -> vector<8x2xf32>
    %c0_11 = arith.constant 0 : index
    %c0_12 = arith.constant 0 : index
    %14 = vector.load %arg5[%c0_11, %c0_12] : memref<1x2xf32, #tpu.memory_space<vmem>>, vector<1x2xf32>
    %15 = vector.broadcast %14 : vector<1x2xf32> to vector<8x2xf32>
    %16 = arith.addf %13, %15 : vector<8x2xf32>
    %c0_13 = arith.constant 0 : index
    %c0_14 = arith.constant 0 : index
    %17 = vector.load %arg7[%c0_13, %c0_14] : memref<8x2xbf16, #tpu.memory_space<vmem>>, vector<8x2xbf16>
    %18 = arith.extf %17 : vector<8x2xbf16> to vector<8x2xf32>
    %19 = arith.mulf %16, %18 : vector<8x2xf32>
    %20 = vector.extract_strided_slice %19 {offsets = [0, 0], sizes = [8, 1], strides = [1, 1]} : vector<8x2xf32> to vector<8x1xf32>
    %21 = vector.extract_strided_slice %19 {offsets = [0, 1], sizes = [8, 1], strides = [1, 1]} : vector<8x2xf32> to vector<8x1xf32>
    %22 = arith.subf %20, %21 : vector<8x1xf32>
    %23 = tpu.iota {dimensions = array<i32: 1>} : vector<8x2xi32>
    %c0_i32 = arith.constant 0 : i32
    %24 = vector.broadcast %c0_i32 : i32 to vector<8x2xi32>
    %25 = arith.cmpi eq, %23, %24 : vector<8x2xi32>
    %cst_15 = arith.constant 0.000000e+00 : f32
    %26 = vector.broadcast %cst_15 : f32 to vector<8x1xf32>
    %27 = arith.subf %26, %22 : vector<8x1xf32>
    %28 = vector.shape_cast %27 : vector<8x1xf32> to vector<8x1xf32>
    %29 = vector.broadcast %28 : vector<8x1xf32> to vector<8x2xf32>
    %30 = vector.shape_cast %22 : vector<8x1xf32> to vector<8x1xf32>
    %31 = vector.broadcast %30 : vector<8x1xf32> to vector<8x2xf32>
    %32 = arith.select %25, %29, %31 : vector<8x2xi1>, vector<8x2xf32>
    %cst_16 = arith.constant 0.000000e+00 : f32
    %33 = vector.broadcast %cst_16 : f32 to vector<8x2xf32>
    %34 = arith.maximumf %32, %33 : vector<8x2xf32>
    %35 = math.absf %32 : vector<8x2xf32>
    %cst_17 = arith.constant 0.000000e+00 : f32
    %36 = vector.broadcast %cst_17 : f32 to vector<8x2xf32>
    %37 = arith.subf %36, %35 : vector<8x2xf32>
    %38 = math.exp %37 : vector<8x2xf32>
    %39 = math.log1p %38 : vector<8x2xf32>
    %40 = arith.addf %34, %39 : vector<8x2xf32>
    %cst_18 = arith.constant 0.000000e+00 : f32
    %41 = vector.broadcast %cst_18 : f32 to vector<8x2xf32>
    %42 = arith.subf %41, %40 : vector<8x2xf32>
    %c0_19 = arith.constant 0 : index
    %c0_20 = arith.constant 0 : index
    %43 = vector.load %arg8[%c0_19, %c0_20] : memref<8x2xf32, #tpu.memory_space<vmem>>, vector<8x2xf32>
    tpu.vector_store %arg8[%c0_19, %c0_20], %42 {strides = array<i32>} : memref<8x2xf32, #tpu.memory_space<vmem>>, vector<8x2xf32>,
    return
  }
  func.func @transform_0(%arg0: i32) -> (i32, i32) {
    %c0_i32 = arith.constant 0 : i32
    %c0_i32_0 = arith.constant 0 : i32
    return %arg0, %c0_i32 : i32, i32
  }
  func.func @transform_1(%arg0: i32) -> (i32, i32) {
    %c0_i32 = arith.constant 0 : i32
    %c0_i32_0 = arith.constant 0 : i32
    %c0_i32_1 = arith.constant 0 : i32
    return %c0_i32, %c0_i32_0 : i32, i32
  }
  func.func @transform_2(%arg0: i32) -> (i32, i32) {
    %c0_i32 = arith.constant 0 : i32
    %c0_i32_0 = arith.constant 0 : i32
    %c0_i32_1 = arith.constant 0 : i32
    return %c0_i32, %c0_i32_0 : i32, i32
  }
  func.func @transform_3(%arg0: i32) -> (i32, i32) {
    %c0_i32 = arith.constant 0 : i32
    %c0_i32_0 = arith.constant 0 : i32
    %c0_i32_1 = arith.constant 0 : i32
    return %c0_i32, %c0_i32_0 : i32, i32
  }
  func.func @transform_4(%arg0: i32) -> (i32, i32) {
    %c0_i32 = arith.constant 0 : i32
    %c0_i32_0 = arith.constant 0 : i32
    %c0_i32_1 = arith.constant 0 : i32
    return %c0_i32, %c0_i32_0 : i32, i32
  }
  func.func @transform_5(%arg0: i32) -> (i32, i32) {
    %c0_i32 = arith.constant 0 : i32
    %c0_i32_0 = arith.constant 0 : i32
    return %arg0, %c0_i32 : i32, i32
  }
  func.func @transform_6(%arg0: i32) -> (i32, i32) {
    %c0_i32 = arith.constant 0 : i32
    %c0_i32_0 = arith.constant 0 : i32
    return %arg0, %c0_i32 : i32, i32
  }
  func.func @transform_7(%arg0: i32) -> (i32, i32) {
    %c0_i32 = arith.constant 0 : i32
    %c0_i32_0 = arith.constant 0 : i32
    return %arg0, %c0_i32 : i32, i32
  }
}

</mosaic_0001>

<bundles_post_ra>
// kernel: tpu_custom_call.1
= control target key start
LH: loop header
LB: loop body
LE: loop exit
PB: predicated region body
PF: predicated region fallthrough
CT: control target
= control target key end

     0   :  { %12 = vsyncpa [#allocation3], 0  ;;  %s1230_s24 = smov [#allocation2]   ;;  %s1340_s0 = inlined_call_operand.vmem [shape: bf16[8,1024], index: 0, kind: input, shape index: {}]   ;;  %s1341_s1 = inlined_call_operand.hbm [shape: bf16[1024,128], index: 1, kind: input, shape index: {}]   ;;  %s1342_s2 = inlined_call_operand.vmem [shape: f32[1,128], index: 2, kind: input, shape index: {}]   ;;  %s1343_s3 = inlined_call_operand.vmem [shape: bf16[128,2], index: 3, kind: input, shape index: {}]   ;;  %s1344_s4 = inlined_call_operand.vmem [shape: f32[1,2], index: 4, kind: input, shape index: {}]   ;;  %s1345_s5 = inlined_call_operand.vmem [shape: bf16[8,128], index: 5, kind: input, shape index: {}]   ;;  %s1346_s6 = inlined_call_operand.vmem [shape: bf16[8,2], index: 6, kind: input, shape index: {}]   ;;  %s1347_s7 = inlined_call_operand.vmem [shape: f32[8,2], index: 7, kind: output, shape index: {}]  }
   0x1   :  { %s20_s25 = sshll.u32 %s1230_s24, 4  ;;  %s1206_s28 = scalar_lea.hbm %s1341_s1, 8192  ;;  %s21_s25 = int_to_ptr.vmem [resolvable:$true] %s20_s25 }
   0x2   :  { %p1207_p0 = scmp.ne.s32.totalorder %s1341_s1, %s1206_s28  ;;  %p1210_p1 = scmp.lt.u32.totalorder %s1206_s28, %s1341_s1 }
   0x4   :  { %p1212_p2 = pnand %p1210_p1, %p1207_p0 }
   0x6   :  { %1215 = shalt.err (!%p1212_p2)
}
   0x7   :  { %s1216_s10 = scalar_lea.vmem %s21_s25, 8192  ;;  %p1221_p4 = scmp.lt.s32.totalorder %s21_s25, %s21_s25 }
   0x8   :  { %p1217_p3 = scmp.ne.s32.totalorder %s21_s25, %s1216_s10  ;;  %p1222_p5 = scmp.lt.s32.totalorder %s1216_s10, %s1216_s10 }
   0xa   :  { %p1223_p6 = por %p1222_p5, %p1221_p4 }
   0xc   :  { %p1224_p7 = pnand %p1223_p6, %p1217_p3 }
   0xe   :  { %1227 = shalt.err (!%p1224_p7)
}
   0xf   :  { %s1231_s11 = smov 64   ;;  %s1232_s12 = smov 4  }
  0x10   :  { %26 = dma.hbm_to_vmem [thread:$0]  %s1341_s1, 8192, %s21_s25, [#allocation3], %s1231_s11, %s1231_s11, %s1232_s12  }
  0x11   :  { %1228 = dma.done.wait [#allocation3], 8192  }
  0x12   :  { %1229 = vsyncadd [#allocation3], 4294959104  ;;  %v1122_v0 = vld [vmem:[#allocation2 + $0x40] sm:$0xff]   ;;  %v1126_v4 = vld [vmem:[#allocation2 + $0x48] sm:$0xff]   ;;  %vm1234_vm0 = vmmov 0   ;;  %vm907_vm3 = vcmask 15360  }
  0x13   :  { %v1123_v1 = vld [vmem:[#allocation2 + $0xc0] sm:$0xff]   ;;  %996 = vmatprep.subr.bf16.mxu0 %v1122_v0  ;;  %v1127_v5 = vld [vmem:[#allocation2 + $0xc8] sm:$0xff]   ;;  %v1130_v8 = vld [vmem:[#allocation2 + $0x50] sm:$0xff]  }
  0x14   :  { %v1124_v2 = vld [vmem:[#allocation2] sm:$0xff]   ;;  %1018 = vmatprep.subr.bf16.mxu1 %v1123_v1  ;;  %v1128_v6 = vld [vmem:[#allocation2 + $0x8] sm:$0xff]   ;;  %v1131_v9 = vld [vmem:[#allocation2 + $0xd0] sm:$0xff]  }
  0x15   :  { %v1125_v3 = vld [vmem:[#allocation2 + $0x80] sm:$0xff]   ;;  %997 = vmatpush3.bf16.msra.mxu0 %v1124_v2  ;;  %v1129_v7 = vld [vmem:[#allocation2 + $0x88] sm:$0xff]   ;;  %v1132_v10 = vld [vmem:[#allocation2 + $0x10] sm:$0xff]  }
  0x16   :  { %1019 = vmatpush3.bf16.msra.mxu1 %v1125_v3  ;;  %998 = vmatprep.subr.bf16.mxu0 %v1126_v4  ;;  %v1133_v11 = vld [vmem:[#allocation2 + $0x90] sm:$0xff]   ;;  %v1134_v12 = vld [vmem:[#allocation2 + $0x58] sm:$0xff]   ;;  %v1138_v16 = vld [vmem:[#allocation2 + $0x60] sm:$0xff]  }
  0x17   :  { %1020 = vmatprep.subr.bf16.mxu1 %v1127_v5  ;;  %v1135_v13 = vld [vmem:[#allocation2 + $0xd8] sm:$0xff]   ;;  %v1139_v17 = vld [vmem:[#allocation2 + $0xe0] sm:$0xff]   ;;  %v1142_v20 = vld [vmem:[#allocation2 + $0x68] sm:$0xff]  }
  0x18   :  { %v1136_v14 = vld [vmem:[#allocation2 + $0x18] sm:$0xff]   ;;  %v1140_v18 = vld [vmem:[#allocation2 + $0x20] sm:$0xff]   ;;  %v1143_v21 = vld [vmem:[#allocation2 + $0xe8] sm:$0xff]  }
  0x19   :  { %999 = vmatpush3.bf16.msra.mxu0 %v1128_v6  ;;  %v1137_v15 = vld [vmem:[#allocation2 + $0x98] sm:$0xff]   ;;  %v1141_v19 = vld [vmem:[#allocation2 + $0xa0] sm:$0xff]   ;;  %v1144_v22 = vld [vmem:[#allocation2 + $0x28] sm:$0xff]  }
  0x1a   :  { %1021 = vmatpush3.bf16.msra.mxu1 %v1129_v7  ;;  %1000 = vmatprep.subr.bf16.mxu0 %v1130_v8  ;;  %v1145_v23 = vld [vmem:[#allocation2 + $0xa8] sm:$0xff]   ;;  %v1146_v24 = vld [vmem:[#allocation2 + $0x70] sm:$0xff]   ;;  %v1150_v28 = vld [vmem:[#allocation2 + $0x78] sm:$0xff]  }
  0x1b   :  { %1022 = vmatprep.subr.bf16.mxu1 %v1131_v9  ;;  %v1147_v25 = vld [vmem:[#allocation2 + $0xf0] sm:$0xff]   ;;  %v1151_v29 = vld [vmem:[#allocation2 + $0xf8] sm:$0xff]   ;;  %v41_v32 = vld [vmem:[%s1340_s0] sm:$0xff] }
  0x1c   :  { %v1148_v26 = vld [vmem:[#allocation2 + $0x30] sm:$0xff]   ;;  %v1152_v30 = vld [vmem:[#allocation2 + $0x38] sm:$0xff]   ;;  %v42_v33 = vld [vmem:[%s1340_s0 + $0x8] sm:$0xff]  ;;  %v915_v34 = vcombine.low %v41_v32, %v41_v32  ;;  %v916_v35 = vcombine.high %v41_v32, %v41_v32 }
  0x1d   :  { %1001 = vmatpush3.bf16.msra.mxu0 %v1132_v10  ;;  %v1149_v27 = vld [vmem:[#allocation2 + $0xb0] sm:$0xff]   ;;  %v1153_v31 = vld [vmem:[#allocation2 + $0xb8] sm:$0xff]   ;;  %v917_v36 = vcombine.low %v42_v33, %v42_v33  ;;  %v918_v37 = vcombine.high %v42_v33, %v42_v33  ;;  %v1158_v38 = vld [vmem:[#allocation2 + $0x140] sm:$0xff]  }
  0x1e   :  { %1023 = vmatpush3.bf16.msra.mxu1 %v1133_v11  ;;  %1002 = vmatprep.subr.bf16.mxu0 %v1134_v12  ;;  %v1159_v39 = vld [vmem:[#allocation2 + $0x1c0] sm:$0xff]   ;;  %v1162_v42 = vld [vmem:[#allocation2 + $0x148] sm:$0xff]   ;;  %v1166_v46 = vld [vmem:[#allocation2 + $0x150] sm:$0xff]  }
  0x1f   :  { %1024 = vmatprep.subr.bf16.mxu1 %v1135_v13  ;;  %624 = vmatprep.mubr.bf16.mxu0 %v916_v35  ;;  %v1160_v40 = vld [vmem:[#allocation2 + $0x100] sm:$0xff]   ;;  %v1163_v43 = vld [vmem:[#allocation2 + $0x1c8] sm:$0xff]   ;;  %v1167_v47 = vld [vmem:[#allocation2 + $0x1d0] sm:$0xff]   ;;  %v1233_v13 = vmov 0.0  }
  0x20   :  { %664 = vmatprep.mubr.bf16.mxu1 %v918_v37  ;;  %v1161_v41 = vld [vmem:[#allocation2 + $0x180] sm:$0xff]   ;;  %v1164_v44 = vld [vmem:[#allocation2 + $0x108] sm:$0xff]   ;;  %v1168_v48 = vld [vmem:[#allocation2 + $0x110] sm:$0xff]  }
  0x21   :  { %1003 = vmatpush3.bf16.msra.mxu0 %v1136_v14  ;;  %v1165_v45 = vld [vmem:[#allocation2 + $0x188] sm:$0xff]   ;;  %v1169_v49 = vld [vmem:[#allocation2 + $0x190] sm:$0xff]   ;;  %v1170_v50 = vld [vmem:[#allocation2 + $0x158] sm:$0xff]  }
  0x22   :  { %1025 = vmatpush3.bf16.msra.mxu1 %v1137_v15  ;;  %1004 = vmatprep.subr.bf16.mxu0 %v1138_v16  ;;  %v1171_v51 = vld [vmem:[#allocation2 + $0x1d8] sm:$0xff]   ;;  %v1174_v54 = vld [vmem:[#allocation2 + $0x160] sm:$0xff]   ;;  %v1178_v58 = vld [vmem:[#allocation2 + $0x168] sm:$0xff]  }
  0x23   :  { %1026 = vmatprep.subr.bf16.mxu1 %v1139_v17  ;;  %v1172_v52 = vld [vmem:[#allocation2 + $0x118] sm:$0xff]   ;;  %v1175_v55 = vld [vmem:[#allocation2 + $0x1e0] sm:$0xff]   ;;  %v1179_v59 = vld [vmem:[#allocation2 + $0x1e8] sm:$0xff]  }
  0x24   :  { %v1173_v53 = vld [vmem:[#allocation2 + $0x198] sm:$0xff]   ;;  %v1176_v56 = vld [vmem:[#allocation2 + $0x120] sm:$0xff]   ;;  %v1180_v60 = vld [vmem:[#allocation2 + $0x128] sm:$0xff]  }
  0x25   :  { %1005 = vmatpush3.bf16.msra.mxu0 %v1140_v18  ;;  %v1177_v57 = vld [vmem:[#allocation2 + $0x1a0] sm:$0xff]   ;;  %v1181_v61 = vld [vmem:[#allocation2 + $0x1a8] sm:$0xff]   ;;  %v1182_v62 = vld [vmem:[#allocation2 + $0x170] sm:$0xff]  }
  0x26   :  { %1027 = vmatpush3.bf16.msra.mxu1 %v1141_v19  ;;  %1006 = vmatprep.subr.bf16.mxu0 %v1142_v20  ;;  %v1183_v63 = vld [vmem:[#allocation2 + $0x1f0] sm:$0xff]   ;;  %v1186_v2 = vld [vmem:[#allocation2 + $0x178] sm:$0xff]   ;;  %v1194_v12 = vld [vmem:[%s1343_s3] sm:$0xff]  }
  0x27   :  { %1028 = vmatprep.subr.bf16.mxu1 %v1143_v21  ;;  %v1184_v0 = vld [vmem:[#allocation2 + $0x130] sm:$0xff]   ;;  %v1187_v3 = vld [vmem:[#allocation2 + $0x1f8] sm:$0xff]   ;;  %v1195_v14 = vld [vmem:[%s1343_s3 + $0x8] sm:$0xff]  }
  0x28   :  { %v1185_v1 = vld [vmem:[#allocation2 + $0x1b0] sm:$0xff]   ;;  %v1188_v4 = vld [vmem:[#allocation2 + $0x138] sm:$0xff]   ;;  %v1198_v17 = vld [vmem:[%s1343_s3 + $0x20] sm:$0xff]  }
  0x29   :  { %1007 = vmatpush3.bf16.msra.mxu0 %v1144_v22  ;;  %v1189_v5 = vld [vmem:[#allocation2 + $0x1b8] sm:$0xff]   ;;  %v43_v6 = vld [vmem:[%s1340_s0 + $0x10] sm:$0xff]  ;;  %v1199_v18 = vld [vmem:[%s1343_s3 + $0x28] sm:$0xff]  }
  0x2a   :  { %1029 = vmatpush3.bf16.msra.mxu1 %v1145_v23  ;;  %1008 = vmatprep.subr.bf16.mxu0 %v1146_v24  ;;  %v919_v7 = vcombine.low %v43_v6, %v43_v6  ;;  %v920_v8 = vcombine.high %v43_v6, %v43_v6  ;;  %v44_v9 = vld [vmem:[%s1340_s0 + $0x18] sm:$0xff]  ;;  %v1196_v15 = vld [vmem:[%s1343_s3 + $0x10] sm:$0xff]   ;;  %v914_v23 = vld [vmem:[%s1342_s2] ss:$0 sm:$0xff] }
  0x2b   :  { %1030 = vmatprep.subr.bf16.mxu1 %v1147_v25  ;;  %v921_v10 = vcombine.low %v44_v9, %v44_v9  ;;  %v922_v11 = vcombine.high %v44_v9, %v44_v9  ;;  %v1197_v16 = vld [vmem:[%s1343_s3 + $0x18] sm:$0xff]   ;;  %v1200_v19 = vld [vmem:[%s1343_s3 + $0x30] sm:$0xff]  }
  0x2c   :  { %v1201_v20 = vld [vmem:[%s1343_s3 + $0x38] sm:$0xff]  }
  0x2d   :  { %1009 = vmatpush3.bf16.msra.mxu0 %v1148_v26 }
  0x2e   :  { %1031 = vmatpush3.bf16.msra.mxu1 %v1149_v27  ;;  %1010 = vmatprep.subr.bf16.mxu0 %v1150_v28 }
  0x2f   :  { %1032 = vmatprep.subr.bf16.mxu1 %v1151_v29 }
  0x31   :  { %1011 = vmatpush3.bf16.msra.mxu0 %v1152_v30 }
  0x32   :  { %1033 = vmatpush3.bf16.msra.mxu1 %v1153_v31  ;;  %1040 = vmatprep.subr.bf16.mxu0 %v1158_v38 }
  0x33   :  { %1062 = vmatprep.subr.bf16.mxu1 %v1159_v39 }
  0x34   :  { %625 = vmatmul.mubr.bf16.vlgmr.msra.gmra.mrb[0].mxu0 %v915_v34 }
  0x35   :  { %665 = vmatmul.mubr.bf16.vlgmr.msra.gmra.mrb[0].mxu1 %v917_v36  ;;  %1041 = vmatpush3.bf16.msra.mxu0 %v1160_v40 }
  0x36   :  { %1063 = vmatpush3.bf16.msra.mxu1 %v1161_v41  ;;  %1042 = vmatprep.subr.bf16.mxu0 %v1162_v42  ;;  %v753_v42 = vld [vmem:[%s1345_s5] sm:$0xf]  ;;  %s1236_s5 = smov 127  }
  0x37   :  { %1064 = vmatprep.subr.bf16.mxu1 %v1163_v43  ;;  %704 = vmatprep.mubr.bf16.mxu0 %v920_v8 }
  0x38   :  { %744 = vmatprep.mubr.bf16.mxu1 %v922_v11 }
  0x39   :  { %1043 = vmatpush3.bf16.msra.mxu0 %v1164_v44 }
  0x3a   :  { %1065 = vmatpush3.bf16.msra.mxu1 %v1165_v45  ;;  %1044 = vmatprep.subr.bf16.mxu0 %v1166_v46 }
  0x3b   :  { %1066 = vmatprep.subr.bf16.mxu1 %v1167_v47  ;;  %v754_v47 = vunpack.c.l.bf16 %v753_v42 }
  0x3d   :  { %1045 = vmatpush3.bf16.msra.mxu0 %v1168_v48 }
  0x3e   :  { %1067 = vmatpush3.bf16.msra.mxu1 %v1169_v49  ;;  %1046 = vmatprep.subr.bf16.mxu0 %v1170_v50 }
  0x3f   :  { %1068 = vmatprep.subr.bf16.mxu1 %v1171_v51  ;;  %v1235_v51 = vmov 0  }
  0x40   :  { %1121 = vset.pattern.permute.xlu1 %v1235_v51  ;;  %1120 = vset.pattern.permute.xlu0 %v1235_v51 }
  0x41   :  { %1047 = vmatpush3.bf16.msra.mxu0 %v1172_v52  ;;  %v868_v52 = vld [vmem:[%s1346_s6] sm:$0xf] }
  0x42   :  { %1069 = vmatpush3.bf16.msra.mxu1 %v1173_v53  ;;  %1048 = vmatprep.subr.bf16.mxu0 %v1174_v54  ;;  %v987_v53 = vld [vmem:[%s1344_s4] ss:$0 sm:$0xff]  ;;  %v869_v54 = vunpack.c.l.bf16 %v868_v52 }
  0x43   :  { %1070 = vmatprep.subr.bf16.mxu1 %v1175_v55 }
  0x45   :  { %1049 = vmatpush3.bf16.msra.mxu0 %v1176_v56 }
  0x46   :  { %1071 = vmatpush3.bf16.msra.mxu1 %v1177_v57  ;;  %1050 = vmatprep.subr.bf16.mxu0 %v1178_v58 }
  0x47   :  { %1072 = vmatprep.subr.bf16.mxu1 %v1179_v59 }
  0x49   :  { %1051 = vmatpush3.bf16.msra.mxu0 %v1180_v60 }
  0x4a   :  { %1073 = vmatpush3.bf16.msra.mxu1 %v1181_v61  ;;  %1052 = vmatprep.subr.bf16.mxu0 %v1182_v62 }
  0x4b   :  { %1074 = vmatprep.subr.bf16.mxu1 %v1183_v63 }
  0x4d   :  { %1053 = vmatpush3.bf16.msra.mxu0 %v1184_v0  ;;  %v876_v0 = vlaneseq }
  0x4e   :  { %1075 = vmatpush3.bf16.msra.mxu1 %v1185_v1  ;;  %1054 = vmatprep.subr.bf16.mxu0 %v1186_v2 }
  0x4f   :  { %1076 = vmatprep.subr.bf16.mxu1 %v1187_v3  ;;  %v877_v1 = vand.u32 127, %v876_v0 }
  0x51   :  { %1055 = vmatpush3.bf16.msra.mxu0 %v1188_v4  ;;  %vm878_vm1 = vcmp.eq.s32.totalorder %v877_v1, 0 }
  0x52   :  { %1077 = vmatpush3.bf16.msra.mxu1 %v1189_v5  ;;  %1093 = vmatprep.subr.bf16.mxu0 %v1233_v13 }
  0x54   :  { %705 = vmatmul.mubr.bf16.vlgmr.msra.gmra.mrb[4].mxu0 %v919_v7 }
  0x55   :  { %745 = vmatmul.mubr.bf16.vlgmr.msra.gmra.mrb[4].mxu1 %v921_v10  ;;  %1094 = vmatpush3.bf16.msra.mxu0 %v1194_v12 }
  0x56   :  { %1095 = vmatprep.subr.bf16.mxu0 %v1233_v13  ;;  %1109 = vmatprep.mubr.msk.bf16.mxu0 %vm1234_vm0, %v1233_v13 }
  0x59   :  { %1096 = vmatpush3.bf16.msra.mxu0 %v1195_v14 }
  0x5a   :  { %1097 = vmatprep.subr.bf16.mxu0 %v1233_v13 }
  0x5d   :  { %1098 = vmatpush3.bf16.msra.mxu0 %v1196_v15 }
  0x5e   :  { %1099 = vmatprep.subr.bf16.mxu0 %v1233_v13 }
  0x61   :  { %1100 = vmatpush3.bf16.msra.mxu0 %v1197_v16 }
  0x62   :  { %1101 = vmatprep.subr.bf16.mxu0 %v1233_v13 }
  0x65   :  { %1102 = vmatpush3.bf16.msra.mxu0 %v1198_v17 }
  0x66   :  { %1103 = vmatprep.subr.bf16.mxu0 %v1233_v13 }
  0x69   :  { %1104 = vmatpush3.bf16.msra.mxu0 %v1199_v18 }
  0x6a   :  { %1105 = vmatprep.subr.bf16.mxu0 %v1233_v13 }
  0x6d   :  { %1106 = vmatpush3.bf16.msra.mxu0 %v1200_v19 }
  0x6e   :  { %1107 = vmatprep.subr.bf16.mxu0 %v1233_v13 }
  0x71   :  { %1108 = vmatpush3.bf16.msra.mxu0 %v1201_v20 }
 0x107   :  { %v1012_v21 = vpop.f32.mrb[0].mxu0 }
 0x108   :  { %v1034_v22 = vpop.f32.mrb[0].mxu1  ;;  %v1013_v24 = vpop.f32.mrb[1].mxu0 }
 0x109   :  { %v1035_v25 = vpop.f32.mrb[1].mxu1  ;;  %v1014_v26 = vadd.f32 %v1013_v24, %v1012_v21  ;;  %v1015_v28 = vpop.f32.mrb[2].mxu0 }
 0x10a   :  { %v1036_v27 = vadd.f32 %v1035_v25, %v1034_v22  ;;  %v1037_v29 = vpop.f32.mrb[2].mxu1  ;;  %v1016_v30 = vpop.f32.mrb[3].mxu0 }
 0x10b   :  { %v1038_v31 = vpop.f32.mrb[3].mxu1  ;;  %v627_v32 = vadd.f32 %v1014_v26, %v914_v23 }
 0x10d   :  { %v667_v33 = vadd.f32 %v1036_v27, %v627_v32 }
 0x127   :  { %v1056_v34 = vpop.f32.mrb[4].mxu0 }
 0x128   :  { %v1078_v35 = vpop.f32.mrb[4].mxu1  ;;  %v1057_v36 = vpop.f32.mrb[5].mxu0 }
 0x129   :  { %v1079_v37 = vpop.f32.mrb[5].mxu1  ;;  %v1058_v38 = vadd.f32 %v1057_v36, %v1056_v34  ;;  %v1059_v40 = vpop.f32.mrb[6].mxu0 }
 0x12a   :  { %v1080_v39 = vadd.f32 %v1079_v37, %v1078_v35  ;;  %v1081_v41 = vpop.f32.mrb[6].mxu1  ;;  %v1060_v43 = vpop.f32.mrb[7].mxu0 }
 0x12b   :  { %v1082_v44 = vpop.f32.mrb[7].mxu1  ;;  %v707_v45 = vadd.f32 %v1058_v38, %v667_v33 }
 0x12d   :  { %v747_v46 = vadd.f32 %v1080_v39, %v707_v45 }
 0x12f   :  { %v752_v48 = vmax.f32 %v747_v46, 0.0 }
 0x131   :  { %v755_v49 = vmul.f32 %v754_v47, %v752_v48 }
 0x133   :  { %v756_v50 = vpack.c.bf16 %v755_v49, %v755_v49 }
 0x135   :  { %1110 = vmatmul.mubr.bf16.vlgmr.msra.gmra.mrb[8].mxu0 %v756_v50 }
 0x208   :  { %v862_v55 = vpop.f32.mrb[8].mxu0 }
 0x209   :  { %v863_v56 = vadd.f32 %v987_v53, %v862_v55  ;;  %v1111_v57 = vpop.f32.mrb[9].mxu0 }
 0x20a   :  { %v865_v58 = vpop.f32.mrb[10].mxu0 }
 0x20b   :  { %v1112_v59 = vpop.f32.mrb[11].mxu0  ;;  %v870_v60 = vmul.f32 %v869_v54, %v863_v56 }
 0x20d   :  { %872 = vrot.lane.b32.xlu0 %v870_v60, %s1236_s5 }
 0x27f   :  { %v873_v61 = vpop.permute.xlu0 %872 }
 0x280   :  { %v875_v62 = vsub.f32 %v870_v60, %v873_v61 }
 0x282   :  { %v879_v63 = vsub.f32 0.0, %v875_v62  ;;  %887 = vperm.xlu1 %1121, %v875_v62  }
 0x284   :  { %882 = vperm.xlu0 %1120, %v879_v63  }
 0x301   :  { %v888_v2 = vpop.permute.xlu1 %887 }
 0x303   :  { %v883_v3 = vpop.permute.xlu0 %882 }
 0x304   :  { %v890_v4 = vsel %vm878_vm1, %v883_v3, %v888_v2 }
 0x305   :  { %v892_v5 = vand.u32 2147483647, %v890_v4  ;;  %v891_v16 = vmax.f32 %v890_v4, 0.0 }
 0x307   :  { %v893_v6 = vsub.f32 0.0, %v892_v5 }
 0x309   :  { %v894_v7 = vmul.f32 1.442695, %v893_v6 }
 0x30b   :  { %1202 = vpow2.f32 %v894_v7 }
 0x315   :  { %v1203_v8 = vpop.eup %1202 }
 0x316   :  { %v896_v9 = vadd.f32 1.0, %v1203_v8  ;;  %v899_v10 = vmul.f32 -0.5, %v1203_v8  ;;  %v902_v12 = vand.u32 2147483647, %v1203_v8 }
 0x318   :  { %1204 = vlog2.f32 %v896_v9  ;;  %v900_v11 = vadd.f32 1.0, %v899_v10  ;;  %vm903_vm2 = vcmp.lt.f32.partialorder %v902_v12, 0.0004427343 }
 0x31a   :  { %v901_v15 = vmul.f32 %v1203_v8, %v900_v11 }
 0x322   :  { %v1205_v13 = vpop.eup %1204 }
 0x323   :  { %v898_v14 = vmul.f32 0.6931472, %v1205_v13 }
 0x325   :  { %v904_v17 = vsel %vm903_vm2, %v901_v15, %v898_v14 }
 0x326   :  { %v905_v18 = vadd.f32 %v904_v17, %v891_v16 }
 0x328   :  { %v906_v19 = vsub.f32 0.0, %v905_v18 }
 0x32a   :  { %908 = vst.msk [vmem:[%s1347_s7] sm:$0xff] %vm907_vm3, %v906_v19 }
 0x32b   :  { %913 = vsyncpa [#allocation3], 1 }

</bundles_post_ra>
